<compile_context>
chip_gen: v5e
topology: v5e:2x2
jax: 0.10.0
libtpu: 0.0.40
codegen_flags: <defaults>
</compile_context>

<pallas_src>
import jax
import jax.numpy as jnp
from jax.experimental import pallas as pl
from jax.experimental.pallas import tpu as pltpu

TB = 128          # batch tile per grid step (raise to 512-8192 for production;
                  # keep padded, double-buffered tiles within v7x's 64 MiB VMEM)
OUT_PAD = 128     # pad fc2 output columns to one full 128-lane vreg
NEG_BIG = -1e30   # bias for padded logit columns -> exp(...) == 0 in the softmax


def policy_kernel(x_ref, w1_ref, b1_ref, w2_ref, b2_ref, o_ref):
    # fc1 on the MXU (bf16 inputs, f32 accumulate), bias add in f32.
    x = x_ref[...].astype(jnp.bfloat16)
    h = jnp.dot(x, w1_ref[...], preferred_element_type=jnp.float32) + b1_ref[...]
    # leaky_relu, PyTorch default negative_slope = 0.01 (f32 on the VPU).
    h = jnp.where(h > 0, h, 0.01 * h)
    # fc2 -> 128-wide padded logits; padded columns carry bias NEG_BIG.
    logits = jnp.dot(h.astype(jnp.bfloat16), w2_ref[...],
                     preferred_element_type=jnp.float32) + b2_ref[...]
    # Numerically stable softmax over the (padded) lane axis.
    m = jnp.max(logits, axis=-1, keepdims=True)
    e = jnp.exp(logits - m)                       # padded cols -> exactly 0
    denom = jnp.sum(e, axis=-1, keepdims=True)
    # Approx reciprocal runs on the EUP slot instead of occupying VALU slots.
    o_ref[...] = e * pl.reciprocal(denom, approx=True)


@jax.jit
def policy_forward(x, w1, b1, w2, b2):
    """Forward pass of the policy network via a gridded Pallas kernel."""
    batch, in_dim = x.shape
    hid = w1.shape[1]
    out_dim = w2.shape[1]

    # Pad batch to a tile multiple so every grid step writes a full block.
    padded_batch = pl.cdiv(batch, TB) * TB
    if padded_batch != batch:
        x = jnp.pad(x, ((0, padded_batch - batch), (0, 0)))

    # Pre-cast weights to bf16 (native MXU path on v6e/v7x); biases stay f32.
    w1b = w1.astype(jnp.bfloat16)
    w2b = jnp.zeros((hid, OUT_PAD), jnp.bfloat16).at[:, :out_dim].set(
        w2.astype(jnp.bfloat16))
    b2p = jnp.full((1, OUT_PAD), NEG_BIG, jnp.float32).at[:, :out_dim].set(b2)

    grid = (padded_batch // TB,)
    out = pl.pallas_call(
        policy_kernel,
        out_shape=jax.ShapeDtypeStruct((padded_batch, OUT_PAD), jnp.float32),
        grid=grid,
        in_specs=[
            pl.BlockSpec((TB, in_dim), lambda i: (i, 0)),    # x: streamed
            pl.BlockSpec((in_dim, hid), lambda i: (0, 0)),   # W1: resident
            pl.BlockSpec((1, hid), lambda i: (0, 0)),        # b1: resident
            pl.BlockSpec((hid, OUT_PAD), lambda i: (0, 0)),  # W2 (padded): resident
            pl.BlockSpec((1, OUT_PAD), lambda i: (0, 0)),    # b2 (padded): resident
        ],
        out_specs=pl.BlockSpec((TB, OUT_PAD), lambda i: (i, 0)),
        compiler_params=pltpu.CompilerParams(
            dimension_semantics=("parallel",)),  # both TCs on v7x
    )(x, w1b, b1, w2b, b2p)

    # Drop batch padding and the padded softmax columns (all zeros).
    return out[:batch, :out_dim]


def init_params(key, in_dim, hid_dim, out_dim):
    """Deterministic init mimicking nn.Linear default (uniform +/- 1/sqrt(fan_in))."""
    k1, k2, k3, k4 = jax.random.split(key, 4)
    lim1 = 1.0 / jnp.sqrt(in_dim)
    lim2 = 1.0 / jnp.sqrt(hid_dim)
    w1 = jax.random.uniform(k1, (in_dim, hid_dim), jnp.float32, -lim1, lim1)
    b1 = jax.random.uniform(k2, (1, hid_dim), jnp.float32, -lim1, lim1)
    w2 = jax.random.uniform(k3, (hid_dim, out_dim), jnp.float32, -lim2, lim2)
    b2 = jax.random.uniform(k4, (1, out_dim), jnp.float32, -lim2, lim2)
    return w1, b1, w2, b2


if __name__ == "__main__":
    in_dim, hid_dim, out_dim = 8, 32, 4
    batch = 256  # exercises a 2-step batch grid (TB=128)

    key = jax.random.PRNGKey(0)
    kx, kp = jax.random.split(key)
    x = jax.random.normal(kx, (batch, in_dim), jnp.float32)
    w1, b1, w2, b2 = init_params(kp, in_dim, hid_dim, out_dim)

    probs = policy_forward(x, w1, b1, w2, b2)
    probs = jax.block_until_ready(probs)

    # Pure-JAX f32 reference (same semantics as the PyTorch module).
    h_ref = x @ w1 + b1
    h_ref = jnp.where(h_ref > 0, h_ref, 0.01 * h_ref)
    ref = jax.nn.softmax(h_ref @ w2 + b2, axis=-1)

    # bf16 MXU inputs + approx reciprocal loosen numerics slightly -> 2e-2 tol.
    assert probs.shape == (batch, out_dim)
    assert jnp.allclose(probs, ref, atol=2e-2, rtol=2e-2), float(
        jnp.max(jnp.abs(probs - ref)))
    assert jnp.allclose(jnp.sum(probs, axis=-1), 1.0, atol=1e-2)

    # TODO(synk): Policy.dist() (Categorical sampling) is host-side logic, not a kernel op.
    print("KERNEL_OK")
</pallas_src>

<mosaic_0001>
module attributes {stable_mosaic.version = 11 : i64} {
  func.func @policy_kernel(%arg0: i32, %arg1: memref<128x8xf32, #tpu.memory_space<vmem>>, %arg2: memref<8x32xbf16, #tpu.memory_space<vmem>>, %arg3: memref<1x32xf32, #tpu.memory_space<vmem>>, %arg4: memref<32x128xbf16, #tpu.memory_space<vmem>>, %arg5: memref<1x128xf32, #tpu.memory_space<vmem>>, %arg6: memref<128x128xf32, #tpu.memory_space<vmem>>) attributes {dimension_semantics = [#tpu.dimension_semantics<parallel>], iteration_bounds = array<i64: 2>, scalar_prefetch = 0 : i64, scratch_operands = 0 : i64, tpu.core_type = #tpu.core_type<tc>, window_params = [{transform_indices = @transform_0, window_bounds = array<i64: 128, 8>}, {pipeline_mode = #tpu.pipeline_mode<synchronous>, transform_indices = @transform_1, window_bounds = array<i64: 8, 32>}, {pipeline_mode = #tpu.pipeline_mode<synchronous>, transform_indices = @transform_2, window_bounds = array<i64: 1, 32>}, {pipeline_mode = #tpu.pipeline_mode<synchronous>, transform_indices = @transform_3, window_bounds = array<i64: 32, 128>}, {pipeline_mode = #tpu.pipeline_mode<synchronous>, transform_indices = @transform_4, window_bounds = array<i64: 1, 128>}, {transform_indices = @transform_5, window_bounds = array<i64: 128, 128>}]} {
    %c0 = arith.constant 0 : index
    %c0_0 = arith.constant 0 : index
    %0 = vector.load %arg1[%c0, %c0_0] : memref<128x8xf32, #tpu.memory_space<vmem>>, vector<128x8xf32>
    %1 = arith.truncf %0 : vector<128x8xf32> to vector<128x8xbf16>
    %c0_1 = arith.constant 0 : index
    %c0_2 = arith.constant 0 : index
    %2 = vector.load %arg2[%c0_1, %c0_2] : memref<8x32xbf16, #tpu.memory_space<vmem>>, vector<8x32xbf16>
    %cst = arith.constant dense<0.000000e+00> : vector<128x32xf32>
    %3 = tpu.matmul %1, %2, %cst {dimension_numbers = #tpu.dot_dimension_numbers<[1], [0], [0], [1], [0, 0, 1, 1], [], []>} : vector<128x8xbf16>, vector<8x32xbf16>, vector<128x32xf32> -> vector<128x32xf32>
    %c0_3 = arith.constant 0 : index
    %c0_4 = arith.constant 0 : index
    %4 = vector.load %arg3[%c0_3, %c0_4] : memref<1x32xf32, #tpu.memory_space<vmem>>, vector<1x32xf32>
    %5 = vector.broadcast %4 : vector<1x32xf32> to vector<128x32xf32>
    %6 = arith.addf %3, %5 : vector<128x32xf32>
    %cst_5 = arith.constant 0.000000e+00 : f32
    %7 = vector.broadcast %cst_5 : f32 to vector<128x32xf32>
    %8 = arith.cmpf ogt, %6, %7 : vector<128x32xf32>
    %cst_6 = arith.constant 0.00999999977 : f32
    %9 = vector.broadcast %cst_6 : f32 to vector<128x32xf32>
    %10 = arith.mulf %9, %6 : vector<128x32xf32>
    %11 = arith.select %8, %6, %10 : vector<128x32xi1>, vector<128x32xf32>
    %12 = arith.truncf %11 : vector<128x32xf32> to vector<128x32xbf16>
    %c0_7 = arith.constant 0 : index
    %c0_8 = arith.constant 0 : index
    %13 = vector.load %arg4[%c0_7, %c0_8] : memref<32x128xbf16, #tpu.memory_space<vmem>>, vector<32x128xbf16>
    %cst_9 = arith.constant dense<0.000000e+00> : vector<128x128xf32>
    %14 = tpu.matmul %12, %13, %cst_9 {dimension_numbers = #tpu.dot_dimension_numbers<[1], [0], [0], [1], [0, 0, 1, 1], [], []>} : vector<128x32xbf16>, vector<32x128xbf16>, vector<128x128xf32> -> vector<128x128xf32>
    %c0_10 = arith.constant 0 : index
    %c0_11 = arith.constant 0 : index
    %15 = vector.load %arg5[%c0_10, %c0_11] : memref<1x128xf32, #tpu.memory_space<vmem>>, vector<1x128xf32>
    %16 = vector.broadcast %15 : vector<1x128xf32> to vector<128x128xf32>
    %17 = arith.addf %14, %16 : vector<128x128xf32>
    %cst_12 = arith.constant dense<0xFF800000> : vector<128xf32>
    %18 = vector.multi_reduction <maximumf>, %17, %cst_12 [1] : vector<128x128xf32> to vector<128xf32>
    %19 = vector.shape_cast %18 : vector<128xf32> to vector<128x1xf32>
    %20 = vector.broadcast %19 : vector<128x1xf32> to vector<128x128xf32>
    %21 = arith.subf %17, %20 : vector<128x128xf32>
    %22 = math.exp %21 : vector<128x128xf32>
    %cst_13 = arith.constant dense<0.000000e+00> : vector<128xf32>
    %23 = vector.multi_reduction <add>, %22, %cst_13 [1] : vector<128x128xf32> to vector<128xf32>
    %24 = vector.shape_cast %23 : vector<128xf32> to vector<128x1xf32>
    %25 = tpu.reciprocal %24 {approx = true} : vector<128x1xf32> -> vector<128x1xf32>
    %26 = vector.broadcast %25 : vector<128x1xf32> to vector<128x128xf32>
    %27 = arith.mulf %22, %26 : vector<128x128xf32>
    %c0_14 = arith.constant 0 : index
    %c0_15 = arith.constant 0 : index
    %28 = vector.load %arg6[%c0_14, %c0_15] : memref<128x128xf32, #tpu.memory_space<vmem>>, vector<128x128xf32>
    tpu.vector_store %arg6[%c0_14, %c0_15], %27 {strides = array<i32>} : memref<128x128xf32, #tpu.memory_space<vmem>>, vector<128x128xf32>,
    return
  }
  func.func @transform_0(%arg0: i32) -> (i32, i32) {
    %c0_i32 = arith.constant 0 : i32
    %c0_i32_0 = arith.constant 0 : i32
    return %arg0, %c0_i32 : i32, i32
  }
  func.func @transform_1(%arg0: i32) -> (i32, i32) {
    %c0_i32 = arith.constant 0 : i32
    %c0_i32_0 = arith.constant 0 : i32
    %c0_i32_1 = arith.constant 0 : i32
    return %c0_i32, %c0_i32_0 : i32, i32
  }
  func.func @transform_2(%arg0: i32) -> (i32, i32) {
    %c0_i32 = arith.constant 0 : i32
    %c0_i32_0 = arith.constant 0 : i32
    %c0_i32_1 = arith.constant 0 : i32
    return %c0_i32, %c0_i32_0 : i32, i32
  }
  func.func @transform_3(%arg0: i32) -> (i32, i32) {
    %c0_i32 = arith.constant 0 : i32
    %c0_i32_0 = arith.constant 0 : i32
    %c0_i32_1 = arith.constant 0 : i32
    return %c0_i32, %c0_i32_0 : i32, i32
  }
  func.func @transform_4(%arg0: i32) -> (i32, i32) {
    %c0_i32 = arith.constant 0 : i32
    %c0_i32_0 = arith.constant 0 : i32
    %c0_i32_1 = arith.constant 0 : i32
    return %c0_i32, %c0_i32_0 : i32, i32
  }
  func.func @transform_5(%arg0: i32) -> (i32, i32) {
    %c0_i32 = arith.constant 0 : i32
    %c0_i32_0 = arith.constant 0 : i32
    return %arg0, %c0_i32 : i32, i32
  }
}

</mosaic_0001>

<bundles_post_ra>
// kernel: policy_forward.1
= control target key start
LH: loop header
LB: loop body
LE: loop exit
PB: predicated region body
PF: predicated region fallthrough
CT: control target
= control target key end

     0   :  { %s854_s18 = smov 0   ;;  %s1053_s0 = inlined_call_operand.vmem [shape: f32[256,8], index: 0, kind: input, shape index: {}]   ;;  %s1054_s1 = inlined_call_operand.vmem [shape: bf16[8,32], index: 1, kind: input, shape index: {}]   ;;  %s1055_s2 = inlined_call_operand.vmem [shape: f32[1,32], index: 2, kind: input, shape index: {}]   ;;  %s1056_s3 = inlined_call_operand.vmem [shape: bf16[32,128], index: 3, kind: input, shape index: {}]   ;;  %s1057_s4 = inlined_call_operand.vmem [shape: f32[1,128], index: 4, kind: input, shape index: {}]   ;;  %s1058_s5 = inlined_call_operand.vmem [shape: f32[256,128], index: 5, kind: output, shape index: {}]  }
   0x1 LB: > { %s702_s19 = sadd.s32 4294967295, %s822_s18   ;;  %p706_p0 = scmp.ge.s32.totalorder %s822_s18, 1  ;;  %s822_s18 = sphi %s854_s18, %s15_s18  }
   0x2   : > { %p188_p1 = scmp.lt.s32.totalorder %s822_s18, 3 }
   0x4   : > { %p189_p2 = pnand %p706_p0, %p188_p1 }
   0x5   : > { %s707_s22 = sshll.u32 (!%p189_p2), %s702_s19, 4 }
   0x6   : > { %192 = sbr.rel (%p189_p2) target bundleno = 665 (0x299), region = 40  ;;  %p217_p3 = scmp.lt.s32.totalorder (!%p189_p2), %s707_s22, 31 }
   0xb   : > { %v253_v0 = vld [vmem:[%s1054_s1] sm:$0xf]  ;;  %vm283_vm0 = vcmask 1043456   ;;  %s1060_s22 = smov (!%p217_p3, %s707_s22), 31  ;;  %vm258_vm1 = vcmask 64512   ;;  %v738_v26 = vld [vmem:[%s1056_s3 + $0x8] sm:$0xff] }
   0xc   : > { %v285_v1 = vsel %vm283_vm0, %v253_v0, 0  ;;  %s708_s23 = sshll.u32 %s1060_s22, 3  ;;  %443 = vmatpush.bf16.msra.mxu1 %v738_v26  ;;  %740 = vmatpush.bf16.msra.mxu2 %v738_v26  ;;  %v737_v27 = vld [vmem:[%s1056_s3] sm:$0xff]  ;;  %vm412_vm4 = vcmask 261120  }
   0xd   : > { %294 = vmatpush.bf16.msra.mxu0 %v285_v1  ;;  %739 = vmatpush.bf16.msra.mxu3 %v285_v1  ;;  %s220_s26 = scalar_lea.vmem %s1053_s0, %s708_s23  ;;  %v890_v29 = vld [vmem:[%s1055_s2] ss:$0 sm:$0xff]  ;;  %s1013_s12 = scalar_lea.vmem %s1058_s5, %s708_s23 }
   0xe   : > { %v229_v2 = vld [vmem:[%s220_s26] sm:$0xff]  ;;  %v230_v3 = vld [vmem:[%s220_s26 + $0x8] sm:$0xff]  ;;  %v231_v5 = vld [vmem:[%s220_s26 + $0x10] sm:$0xff] }
   0xf   : > { %v245_v4 = vpack.c.bf16 %v230_v3, %v229_v2  ;;  %v232_v6 = vld [vmem:[%s220_s26 + $0x18] sm:$0xff]  ;;  %v233_v8 = vld [vmem:[%s220_s26 + $0x20] sm:$0xff]  ;;  %v234_v9 = vld [vmem:[%s220_s26 + $0x28] sm:$0xff] }
  0x10   : > { %v246_v7 = vpack.c.bf16 %v232_v6, %v231_v5  ;;  %v247_v10 = vpack.c.bf16 %v234_v9, %v233_v8  ;;  %v239_v11 = vld [vmem:[%s220_s26 + $0x50] sm:$0xff]  ;;  %v240_v12 = vld [vmem:[%s220_s26 + $0x58] sm:$0xff]  ;;  %v241_v16 = vld [vmem:[%s220_s26 + $0x60] sm:$0xff]  ;;  %444 = vmatpush.bf16.msra.mxu1 %v737_v27  ;;  %741 = vmatpush.bf16.msra.mxu2 %v737_v27 }
  0x11   : > { %711 = vmatmul.msk.bf16.vlgmr.msra.gmra.mxu0 %vm258_vm1, %v245_v4  ;;  %v250_v13 = vpack.c.bf16 %v240_v12, %v239_v11  ;;  %v235_v14 = vld [vmem:[%s220_s26 + $0x30] sm:$0xff]  ;;  %v236_v15 = vld [vmem:[%s220_s26 + $0x38] sm:$0xff]  ;;  %v242_v17 = vld [vmem:[%s220_s26 + $0x68] sm:$0xff] }
  0x12   : > { %v248_v18 = vpack.c.bf16 %v236_v15, %v235_v14  ;;  %v251_v19 = vpack.c.bf16 %v242_v17, %v241_v16  ;;  %v237_v20 = vld [vmem:[%s220_s26 + $0x40] sm:$0xff]  ;;  %v238_v21 = vld [vmem:[%s220_s26 + $0x48] sm:$0xff]  ;;  %v243_v22 = vld [vmem:[%s220_s26 + $0x70] sm:$0xff] }
  0x13   : > { %716 = vmatmul.msk.bf16.vlgmr.msra.gmra.mxu3 %vm258_vm1, %v250_v13  ;;  %v244_v23 = vld [vmem:[%s220_s26 + $0x78] sm:$0xff]  ;;  %v249_v24 = vpack.c.bf16 %v238_v21, %v237_v20 }
  0x14   : > { %v252_v25 = vpack.c.bf16 %v244_v23, %v243_v22 }
  0x21   : > { %712 = vmatmul.msk.bf16.gmra.mxu0 %vm258_vm1, %v246_v7 }
  0x23   : > { %717 = vmatmul.msk.bf16.gmra.mxu3 %vm258_vm1, %v251_v19 }
  0x31   : > { %713 = vmatmul.msk.bf16.gmra.mxu0 %vm258_vm1, %v247_v10 }
  0x33   : > { %718 = vmatmul.msk.bf16.gmra.mxu3 %vm258_vm1, %v252_v25 }
  0x41   : > { %714 = vmatmul.msk.bf16.gmra.mxu0 %vm258_vm1, %v248_v18 }
  0x51   : > { %715 = vmatmul.msk.bf16.gmra.mxu0 %vm258_vm1, %v249_v24 }
  0x8e   : > { %v296_v28 = vpop.f32.mrf.mxu0 }
  0x8f   : > { %v297_v30 = vadd.f32 %v890_v29, %v296_v28 }
  0x91   : > { %v352_v32 = vmul.f32 0.01, %v297_v30  ;;  %vm336_vm2 = vcmp.gt.f32.partialorder %v297_v30, 0.0 }
  0x93   : > { %v368_v35 = vsel %vm336_vm2, %v297_v30, %v352_v32 }
  0x96   : > { %v298_v31 = vpop.f32.mrf.mxu0  ;;  %v321_v1 = vpop.f32.mrf.mxu3 }
  0x97   : > { %v299_v33 = vadd.f32 %v890_v29, %v298_v31  ;;  %v322_v13 = vadd.f32 %v890_v29, %v321_v1 }
  0x99   : > { %vm337_vm3 = vcmp.gt.f32.partialorder %v299_v33, 0.0  ;;  %v353_v34 = vmul.f32 0.01, %v299_v33  ;;  %v362_v15 = vmul.f32 0.01, %v322_v13  ;;  %vm346_vm13 = vcmp.gt.f32.partialorder %v322_v13, 0.0 }
  0x9b   : > { %v369_v36 = vsel %vm337_vm3, %v299_v33, %v353_v34  ;;  %v378_v17 = vsel %vm346_vm13, %v322_v13, %v362_v15 }
  0x9c   : > { %v384_v37 = vpack.c.bf16 %v369_v36, %v368_v35 }
  0x9e   : > { %v301_v38 = vpop.f32.mrf.mxu0  ;;  %727 = vmatmul.msk.bf16.vlgmr.msra.gmra.mxu1 %vm412_vm4, %v384_v37  ;;  %v323_v5 = vpop.f32.mrf.mxu3 }
  0x9f   : > { %v302_v39 = vadd.f32 %v890_v29, %v301_v38  ;;  %v324_v14 = vadd.f32 %v890_v29, %v323_v5  ;;  %v751_v38 = vld [vmem:[%s1057_s4] ss:$0 sm:$0xff] }
  0xa1   : > { %v354_v41 = vmul.f32 0.01, %v302_v39  ;;  %vm338_vm5 = vcmp.gt.f32.partialorder %v302_v39, 0.0  ;;  %v363_v16 = vmul.f32 0.01, %v324_v14  ;;  %vm347_vm14 = vcmp.gt.f32.partialorder %v324_v14, 0.0 }
  0xa3   : > { %v370_v44 = vsel %vm338_vm5, %v302_v39, %v354_v41  ;;  %v379_v18 = vsel %vm347_vm14, %v324_v14, %v363_v16 }
  0xa4   : > { %v389_v20 = vpack.c.bf16 %v379_v18, %v378_v17 }
  0xa6   : > { %v303_v40 = vpop.f32.mrf.mxu0  ;;  %v326_v12 = vpop.f32.mrf.mxu3 }
  0xa7   : > { %v304_v42 = vadd.f32 %v890_v29, %v303_v40  ;;  %v327_v21 = vadd.f32 %v890_v29, %v326_v12 }
  0xa9   : > { %vm339_vm6 = vcmp.gt.f32.partialorder %v304_v42, 0.0  ;;  %v355_v43 = vmul.f32 0.01, %v304_v42  ;;  %v364_v24 = vmul.f32 0.01, %v327_v21  ;;  %vm348_vm15 = vcmp.gt.f32.partialorder %v327_v21, 0.0 }
  0xab   : > { %v371_v45 = vsel %vm339_vm6, %v304_v42, %v355_v43  ;;  %v380_v26 = vsel %vm348_vm15, %v327_v21, %v364_v24 }
  0xac   : > { %v385_v46 = vpack.c.bf16 %v371_v45, %v370_v44 }
  0xae   : > { %v306_v47 = vpop.f32.mrf.mxu0  ;;  %728 = vmatmul.msk.bf16.gmra.mxu1 %vm412_vm4, %v385_v46  ;;  %v328_v19 = vpop.f32.mrf.mxu3 }
  0xaf   : > { %v307_v48 = vadd.f32 %v890_v29, %v306_v47  ;;  %v329_v22 = vadd.f32 %v890_v29, %v328_v19 }
  0xb1   : > { %v356_v50 = vmul.f32 0.01, %v307_v48  ;;  %vm340_vm7 = vcmp.gt.f32.partialorder %v307_v48, 0.0  ;;  %v365_v25 = vmul.f32 0.01, %v329_v22  ;;  %vm349_vm0 = vcmp.gt.f32.partialorder %v329_v22, 0.0 }
  0xb3   : > { %v372_v53 = vsel %vm340_vm7, %v307_v48, %v356_v50  ;;  %v381_v27 = vsel %vm349_vm0, %v329_v22, %v365_v25 }
  0xb4   : > { %v390_v28 = vpack.c.bf16 %v381_v27, %v380_v26 }
  0xb6   : > { %v308_v49 = vpop.f32.mrf.mxu0  ;;  %v331_v23 = vpop.f32.mrf.mxu3 }
  0xb7   : > { %v309_v51 = vadd.f32 %v890_v29, %v308_v49  ;;  %v332_v31 = vadd.f32 %v890_v29, %v331_v23 }
  0xb9   : > { %vm341_vm8 = vcmp.gt.f32.partialorder %v309_v51, 0.0  ;;  %v357_v52 = vmul.f32 0.01, %v309_v51  ;;  %v366_v33 = vmul.f32 0.01, %v332_v31  ;;  %vm350_vm1 = vcmp.gt.f32.partialorder %v332_v31, 0.0 }
  0xbb   : > { %v373_v54 = vsel %vm341_vm8, %v309_v51, %v357_v52  ;;  %v382_v35 = vsel %vm350_vm1, %v332_v31, %v366_v33 }
  0xbc   : > { %v386_v55 = vpack.c.bf16 %v373_v54, %v372_v53 }
  0xbe   : > { %v311_v56 = vpop.f32.mrf.mxu0  ;;  %729 = vmatmul.msk.bf16.gmra.mxu1 %vm412_vm4, %v386_v55  ;;  %v333_v30 = vpop.f32.mrf.mxu3 }
  0xbf   : > { %v312_v57 = vadd.f32 %v890_v29, %v311_v56  ;;  %v334_v32 = vadd.f32 %v890_v29, %v333_v30 }
  0xc1   : > { %v358_v59 = vmul.f32 0.01, %v312_v57  ;;  %vm342_vm9 = vcmp.gt.f32.partialorder %v312_v57, 0.0  ;;  %v367_v34 = vmul.f32 0.01, %v334_v32  ;;  %vm351_vm2 = vcmp.gt.f32.partialorder %v334_v32, 0.0 }
  0xc3   : > { %v374_v62 = vsel %vm342_vm9, %v312_v57, %v358_v59  ;;  %v383_v36 = vsel %vm351_vm2, %v334_v32, %v367_v34 }
  0xc4   : > { %v391_v37 = vpack.c.bf16 %v383_v36, %v382_v35 }
  0xc6   : > { %v313_v58 = vpop.f32.mrf.mxu0 }
  0xc7   : > { %v314_v60 = vadd.f32 %v890_v29, %v313_v58 }
  0xc9   : > { %vm343_vm10 = vcmp.gt.f32.partialorder %v314_v60, 0.0  ;;  %v359_v61 = vmul.f32 0.01, %v314_v60 }
  0xcb   : > { %v375_v63 = vsel %vm343_vm10, %v314_v60, %v359_v61 }
  0xcc   : > { %v387_v0 = vpack.c.bf16 %v375_v63, %v374_v62 }
  0xce   : > { %v316_v2 = vpop.f32.mrf.mxu0  ;;  %730 = vmatmul.msk.bf16.gmra.mxu1 %vm412_vm4, %v387_v0 }
  0xcf   : > { %v317_v3 = vadd.f32 %v890_v29, %v316_v2 }
  0xd1   : > { %v360_v6 = vmul.f32 0.01, %v317_v3  ;;  %vm344_vm11 = vcmp.gt.f32.partialorder %v317_v3, 0.0 }
  0xd3   : > { %v376_v9 = vsel %vm344_vm11, %v317_v3, %v360_v6 }
  0xd6   : > { %v318_v4 = vpop.f32.mrf.mxu0 }
  0xd7   : > { %v319_v7 = vadd.f32 %v890_v29, %v318_v4 }
  0xd9   : > { %vm345_vm12 = vcmp.gt.f32.partialorder %v319_v7, 0.0  ;;  %v361_v8 = vmul.f32 0.01, %v319_v7 }
  0xdb   : > { %v377_v10 = vsel %vm345_vm12, %v319_v7, %v361_v8 }
  0xdc   : > { %v388_v11 = vpack.c.bf16 %v377_v10, %v376_v9 }
  0xde   : > { %731 = vmatmul.msk.bf16.vlgmr.msra.gmra.mxu2 %vm412_vm4, %v388_v11 }
  0xee   : > { %732 = vmatmul.msk.bf16.gmra.mxu2 %vm412_vm4, %v389_v20 }
  0xfe   : > { %733 = vmatmul.msk.bf16.gmra.mxu2 %vm412_vm4, %v390_v28 }
 0x10e   : > { %734 = vmatmul.msk.bf16.gmra.mxu2 %vm412_vm4, %v391_v37 }
 0x11b   : > { %v446_v39 = vpop.f32.mrf.mxu1 }
 0x11c   : > { %v447_v40 = vadd.f32 %v751_v38, %v446_v39 }
 0x11e   : > { %486 = vmax.xlane.f32.xlu0 %v447_v40 }
 0x123   : > { %v448_v41 = vpop.f32.mrf.mxu1 }
 0x124   : > { %v449_v42 = vadd.f32 %v751_v38, %v448_v41 }
 0x126   : > { %488 = vmax.xlane.f32.xlu0 %v449_v42 }
 0x12b   : > { %v451_v29 = vpop.f32.mrf.mxu1 }
 0x12c   : > { %v452_v43 = vadd.f32 %v751_v38, %v451_v29 }
 0x12e   : > { %490 = vmax.xlane.f32.xlu1 %v452_v43 }
 0x133   : > { %v453_v44 = vpop.f32.mrf.mxu1 }
 0x134   : > { %v454_v45 = vadd.f32 %v751_v38, %v453_v44 }
 0x136   : > { %492 = vmax.xlane.f32.xlu1 %v454_v45 }
 0x13b   : > { %v456_v46 = vpop.f32.mrf.mxu1 }
 0x13c   : > { %v457_v47 = vadd.f32 %v751_v38, %v456_v46 }
 0x13e   : > { %494 = vmax.xlane.f32.xlu2 %v457_v47 }
 0x143   : > { %v458_v48 = vpop.f32.mrf.mxu1 }
 0x144   : > { %v919_v49 = vadd.f32 %v751_v38, %v458_v48 }
 0x146   : > { %496 = vmax.xlane.f32.xlu2 %v919_v49 }
 0x14b   : > { %v461_v50 = vpop.f32.mrf.mxu1 }
 0x14c   : > { %v922_v51 = vadd.f32 %v751_v38, %v461_v50 }
 0x14e   : > { %498 = vmax.xlane.f32.xlu0 %v922_v51 }
 0x153   : > { %v463_v52 = vpop.f32.mrf.mxu1 }
 0x154   : > { %v925_v53 = vadd.f32 %v751_v38, %v463_v52 }
 0x156   : > { %500 = vmax.xlane.f32.xlu1 %v925_v53 }
 0x161   : > { %v466_v54 = vpop.f32.mrf.mxu2 }
 0x162   : > { %v928_v55 = vadd.f32 %v751_v38, %v466_v54 }
 0x164   : > { %502 = vmax.xlane.f32.xlu2 %v928_v55 }
 0x169   : > { %v468_v56 = vpop.f32.mrf.mxu2 }
 0x16a   : > { %v931_v57 = vadd.f32 %v751_v38, %v468_v56 }
 0x16c   : > { %504 = vmax.xlane.f32.xlu0 %v931_v57 }
 0x171   : > { %v471_v58 = vpop.f32.mrf.mxu2 }
 0x172   : > { %v934_v59 = vadd.f32 %v751_v38, %v471_v58 }
 0x174   : > { %506 = vmax.xlane.f32.xlu1 %v934_v59 }
 0x179   : > { %v473_v60 = vpop.f32.mrf.mxu2 }
 0x17a   : > { %v937_v61 = vadd.f32 %v751_v38, %v473_v60 }
 0x17c   : > { %508 = vmax.xlane.f32.xlu2 %v937_v61 }
 0x181   : > { %v476_v62 = vpop.f32.mrf.mxu2 }
 0x182   : > { %v940_v63 = vadd.f32 %v751_v38, %v476_v62 }
 0x184   : > { %510 = vmax.xlane.f32.xlu0 %v940_v63 }
 0x189   : > { %v478_v0 = vpop.f32.mrf.mxu2 }
 0x18a   : > { %v943_v1 = vadd.f32 %v751_v38, %v478_v0 }
 0x18c   : > { %512 = vmax.xlane.f32.xlu1 %v943_v1 }
 0x191   : > { %v481_v2 = vpop.f32.mrf.mxu2  ;;  %v487_v3 = vpop.xlane.xlu0 %486 }
 0x192   : > { %v946_v4 = vadd.f32 %v751_v38, %v481_v2  ;;  %v518_v5 = vsub.f32 %v447_v40, %v487_v3 }
 0x194   : > { %v534_v6 = vmul.f32 1.442695, %v518_v5  ;;  %514 = vmax.xlane.f32.xlu2 %v946_v4 }
 0x196   : > { %752 = vpow2.f32 %v534_v6 }
 0x199   : > { %v483_v7 = vpop.f32.mrf.mxu2  ;;  %v489_v8 = vpop.xlane.xlu0 %488 }
 0x19a   : > { %v949_v9 = vadd.f32 %v751_v38, %v483_v7  ;;  %v519_v10 = vsub.f32 %v449_v42, %v489_v8 }
 0x19c   : > { %v951_v11 = vpop.eup %752  ;;  %v536_v12 = vmul.f32 1.442695, %v519_v10  ;;  %516 = vmax.xlane.f32.xlu0 %v949_v9 }
 0x19d   : > { %566 = vadd.xlane.f32.xlu1 %v951_v11 }
 0x19e   : > { %754 = vpow2.f32 %v536_v12 }
 0x1a1   : > { %v491_v13 = vpop.xlane.xlu1 %490 }
 0x1a2   : > { %v520_v14 = vsub.f32 %v452_v43, %v491_v13 }
 0x1a4   : > { %v955_v15 = vpop.eup %754  ;;  %v538_v16 = vmul.f32 1.442695, %v520_v14 }
 0x1a5   : > { %568 = vadd.xlane.f32.xlu2 %v955_v15 }
 0x1a6   : > { %756 = vpow2.f32 %v538_v16 }
 0x1a9   : > { %v493_v17 = vpop.xlane.xlu1 %492 }
 0x1aa   : > { %v521_v18 = vsub.f32 %v454_v45, %v493_v17 }
 0x1ac   : > { %v958_v19 = vpop.eup %756  ;;  %v540_v20 = vmul.f32 1.442695, %v521_v18 }
 0x1ad   : > { %570 = vadd.xlane.f32.xlu0 %v958_v19 }
 0x1ae   : > { %758 = vpow2.f32 %v540_v20 }
 0x1b1   : > { %v495_v21 = vpop.xlane.xlu2 %494 }
 0x1b2   : > { %v522_v22 = vsub.f32 %v457_v47, %v495_v21 }
 0x1b4   : > { %v961_v23 = vpop.eup %758  ;;  %v542_v24 = vmul.f32 1.442695, %v522_v22 }
 0x1b5   : > { %572 = vadd.xlane.f32.xlu1 %v961_v23 }
 0x1b6   : > { %760 = vpow2.f32 %v542_v24 }
 0x1b9   : > { %v497_v25 = vpop.xlane.xlu2 %496 }
 0x1ba   : > { %v523_v26 = vsub.f32 %v919_v49, %v497_v25 }
 0x1bc   : > { %v965_v27 = vpop.eup %760  ;;  %v544_v28 = vmul.f32 1.442695, %v523_v26 }
 0x1bd   : > { %574 = vadd.xlane.f32.xlu2 %v965_v27 }
 0x1be   : > { %762 = vpow2.f32 %v544_v28 }
 0x1c1   : > { %v499_v30 = vpop.xlane.xlu0 %498 }
 0x1c2   : > { %v524_v31 = vsub.f32 %v922_v51, %v499_v30 }
 0x1c4   : > { %v969_v32 = vpop.eup %762  ;;  %v546_v33 = vmul.f32 1.442695, %v524_v31 }
 0x1c5   : > { %576 = vadd.xlane.f32.xlu0 %v969_v32 }
 0x1c6   : > { %764 = vpow2.f32 %v546_v33 }
 0x1c9   : > { %v501_v34 = vpop.xlane.xlu1 %500 }
 0x1ca   : > { %v525_v35 = vsub.f32 %v925_v53, %v501_v34 }
 0x1cc   : > { %v973_v36 = vpop.eup %764  ;;  %v548_v37 = vmul.f32 1.442695, %v525_v35 }
 0x1cd   : > { %578 = vadd.xlane.f32.xlu1 %v973_v36 }
 0x1ce   : > { %766 = vpow2.f32 %v548_v37 }
 0x1d4   : > { %v976_v38 = vpop.eup %766 }
 0x1d5   : > { %580 = vadd.xlane.f32.xlu2 %v976_v38 }
 0x1d7   : > { %v503_v39 = vpop.xlane.xlu2 %502 }
 0x1d8   : > { %v526_v40 = vsub.f32 %v928_v55, %v503_v39 }
 0x1da   : > { %v550_v41 = vmul.f32 1.442695, %v526_v40 }
 0x1dc   : > { %768 = vpow2.f32 %v550_v41 }
 0x1df   : > { %v505_v42 = vpop.xlane.xlu0 %504 }
 0x1e0   : > { %v527_v29 = vsub.f32 %v931_v57, %v505_v42 }
 0x1e2   : > { %v981_v43 = vpop.eup %768  ;;  %v552_v44 = vmul.f32 1.442695, %v527_v29 }
 0x1e3   : > { %582 = vadd.xlane.f32.xlu0 %v981_v43 }
 0x1e4   : > { %770 = vpow2.f32 %v552_v44 }
 0x1e7   : > { %v507_v45 = vpop.xlane.xlu1 %506 }
 0x1e8   : > { %v528_v46 = vsub.f32 %v934_v59, %v507_v45 }
 0x1ea   : > { %v985_v47 = vpop.eup %770  ;;  %v554_v48 = vmul.f32 1.442695, %v528_v46 }
 0x1eb   : > { %584 = vadd.xlane.f32.xlu1 %v985_v47 }
 0x1ec   : > { %772 = vpow2.f32 %v554_v48 }
 0x1ef   : > { %v509_v49 = vpop.xlane.xlu2 %508 }
 0x1f0   : > { %v529_v50 = vsub.f32 %v937_v61, %v509_v49 }
 0x1f2   : > { %v989_v51 = vpop.eup %772  ;;  %v556_v52 = vmul.f32 1.442695, %v529_v50 }
 0x1f3   : > { %586 = vadd.xlane.f32.xlu2 %v989_v51 }
 0x1f4   : > { %774 = vpow2.f32 %v556_v52 }
 0x1f7   : > { %v511_v53 = vpop.xlane.xlu0 %510 }
 0x1f8   : > { %v530_v54 = vsub.f32 %v940_v63, %v511_v53 }
 0x1fa   : > { %v993_v55 = vpop.eup %774  ;;  %v558_v56 = vmul.f32 1.442695, %v530_v54 }
 0x1fb   : > { %588 = vadd.xlane.f32.xlu0 %v993_v55 }
 0x1fc   : > { %776 = vpow2.f32 %v558_v56 }
 0x1ff   : > { %v513_v57 = vpop.xlane.xlu1 %512 }
 0x200   : > { %v531_v58 = vsub.f32 %v943_v1, %v513_v57 }
 0x202   : > { %v997_v59 = vpop.eup %776  ;;  %v560_v60 = vmul.f32 1.442695, %v531_v58 }
 0x203   : > { %590 = vadd.xlane.f32.xlu1 %v997_v59 }
 0x204   : > { %778 = vpow2.f32 %v560_v60 }
 0x207   : > { %v515_v61 = vpop.xlane.xlu2 %514 }
 0x208   : > { %v532_v62 = vsub.f32 %v946_v4, %v515_v61 }
 0x20a   : > { %v1001_v63 = vpop.eup %778  ;;  %v562_v0 = vmul.f32 1.442695, %v532_v62 }
 0x20b   : > { %592 = vadd.xlane.f32.xlu2 %v1001_v63 }
 0x20c   : > { %780 = vpow2.f32 %v562_v0 }
 0x20f   : > { %v517_v2 = vpop.xlane.xlu0 %516 }
 0x210   : > { %v533_v3 = vsub.f32 %v949_v9, %v517_v2  ;;  %v567_v1 = vpop.xlane.xlu1 %566 }
 0x211   : > { %782 = vrcp.f32 %v567_v1 }
 0x212   : > { %v1005_v5 = vpop.eup %780  ;;  %v564_v6 = vmul.f32 1.442695, %v533_v3 }
 0x213   : > { %594 = vadd.xlane.f32.xlu0 %v1005_v5 }
 0x214   : > { %784 = vpow2.f32 %v564_v6 }
 0x217   : > { %v783_v7 = vpop.eup %782 }
 0x218   : > { %v614_v4 = vmul.f32 %v783_v7, %v951_v11  ;;  %v569_v8 = vpop.xlane.xlu2 %568 }
 0x219   : > { %786 = vrcp.f32 %v569_v8 }
 0x21a   : > { %v1016_v9 = vpop.eup %784  ;;  %630 = vst [vmem:[%s1013_s12] sm:$0xff] %v614_v4 }
 0x21b   : > { %596 = vadd.xlane.f32.xlu1 %v1016_v9 }
 0x21f   : > { %v787_v10 = vpop.eup %786 }
 0x220   : > { %v615_v12 = vmul.f32 %v787_v10, %v955_v15  ;;  %v571_v13 = vpop.xlane.xlu0 %570 }
 0x221   : > { %788 = vrcp.f32 %v571_v13 }
 0x222   : > { %631 = vst [vmem:[%s1013_s12 + $0x8] sm:$0xff] %v615_v12 }
 0x227   : > { %v789_v14 = vpop.eup %788 }
 0x228   : > { %v616_v16 = vmul.f32 %v789_v14, %v958_v19  ;;  %v573_v17 = vpop.xlane.xlu1 %572 }
 0x229   : > { %790 = vrcp.f32 %v573_v17 }
 0x22a   : > { %632 = vst [vmem:[%s1013_s12 + $0x10] sm:$0xff] %v616_v16 }
 0x22f   : > { %v791_v11 = vpop.eup %790 }
 0x230   : > { %v617_v18 = vmul.f32 %v791_v11, %v961_v23  ;;  %v575_v20 = vpop.xlane.xlu2 %574 }
 0x231   : > { %792 = vrcp.f32 %v575_v20 }
 0x232   : > { %633 = vst [vmem:[%s1013_s12 + $0x18] sm:$0xff] %v617_v18 }
 0x237   : > { %v793_v21 = vpop.eup %792 }
 0x238   : > { %v618_v15 = vmul.f32 %v793_v21, %v965_v27  ;;  %v577_v22 = vpop.xlane.xlu0 %576 }
 0x239   : > { %794 = vrcp.f32 %v577_v22 }
 0x23a   : > { %634 = vst [vmem:[%s1013_s12 + $0x20] sm:$0xff] %v618_v15 }
 0x23f   : > { %v795_v24 = vpop.eup %794 }
 0x240   : > { %v619_v19 = vmul.f32 %v795_v24, %v969_v32  ;;  %v579_v25 = vpop.xlane.xlu1 %578 }
 0x241   : > { %796 = vrcp.f32 %v579_v25 }
 0x242   : > { %635 = vst [vmem:[%s1013_s12 + $0x28] sm:$0xff] %v619_v19 }
 0x247   : > { %v797_v26 = vpop.eup %796 }
 0x248   : > { %v620_v23 = vmul.f32 %v797_v26, %v973_v36  ;;  %v581_v28 = vpop.xlane.xlu2 %580 }
 0x249   : > { %798 = vrcp.f32 %v581_v28 }
 0x24a   : > { %636 = vst [vmem:[%s1013_s12 + $0x30] sm:$0xff] %v620_v23 }
 0x24f   : > { %v799_v30 = vpop.eup %798 }
 0x250   : > { %v621_v27 = vmul.f32 %v799_v30, %v976_v38 }
 0x252   : > { %637 = vst [vmem:[%s1013_s12 + $0x38] sm:$0xff] %v621_v27 }
 0x256   : > { %v583_v31 = vpop.xlane.xlu0 %582 }
 0x257   : > { %800 = vrcp.f32 %v583_v31 }
 0x25d   : > { %v801_v33 = vpop.eup %800 }
 0x25e   : > { %v622_v32 = vmul.f32 %v801_v33, %v981_v43  ;;  %v585_v34 = vpop.xlane.xlu1 %584 }
 0x25f   : > { %802 = vrcp.f32 %v585_v34 }
 0x260   : > { %638 = vst [vmem:[%s1013_s12 + $0x40] sm:$0xff] %v622_v32 }
 0x265   : > { %v803_v35 = vpop.eup %802 }
 0x266   : > { %v623_v36 = vmul.f32 %v803_v35, %v985_v47  ;;  %v587_v37 = vpop.xlane.xlu2 %586 }
 0x267   : > { %804 = vrcp.f32 %v587_v37 }
 0x268   : > { %639 = vst [vmem:[%s1013_s12 + $0x48] sm:$0xff] %v623_v36 }
 0x26d   : > { %v805_v39 = vpop.eup %804 }
 0x26e   : > { %v624_v38 = vmul.f32 %v805_v39, %v989_v51  ;;  %v589_v40 = vpop.xlane.xlu0 %588 }
 0x26f   : > { %806 = vrcp.f32 %v589_v40 }
 0x270   : > { %640 = vst [vmem:[%s1013_s12 + $0x50] sm:$0xff] %v624_v38 }
 0x275   : > { %v807_v41 = vpop.eup %806 }
 0x276   : > { %v625_v42 = vmul.f32 %v807_v41, %v993_v55  ;;  %v591_v29 = vpop.xlane.xlu1 %590 }
 0x277   : > { %808 = vrcp.f32 %v591_v29 }
 0x278   : > { %641 = vst [vmem:[%s1013_s12 + $0x58] sm:$0xff] %v625_v42 }
 0x27d   : > { %v809_v43 = vpop.eup %808 }
 0x27e   : > { %v626_v44 = vmul.f32 %v809_v43, %v997_v59  ;;  %v593_v45 = vpop.xlane.xlu2 %592 }
 0x27f   : > { %810 = vrcp.f32 %v593_v45 }
 0x280   : > { %642 = vst [vmem:[%s1013_s12 + $0x60] sm:$0xff] %v626_v44 }
 0x285   : > { %v811_v46 = vpop.eup %810 }
 0x286   : > { %v627_v47 = vmul.f32 %v811_v46, %v1001_v63  ;;  %v595_v48 = vpop.xlane.xlu0 %594 }
 0x287   : > { %812 = vrcp.f32 %v595_v48 }
 0x288   : > { %643 = vst [vmem:[%s1013_s12 + $0x68] sm:$0xff] %v627_v47 }
 0x28d   : > { %v813_v49 = vpop.eup %812 }
 0x28e   : > { %v628_v50 = vmul.f32 %v813_v49, %v1005_v5  ;;  %v597_v51 = vpop.xlane.xlu1 %596 }
 0x28f   : > { %814 = vrcp.f32 %v597_v51 }
 0x290   : > { %644 = vst [vmem:[%s1013_s12 + $0x70] sm:$0xff] %v628_v50 }
 0x295   : > { %v815_v52 = vpop.eup %814 }
 0x296   : > { %v629_v53 = vmul.f32 %v815_v52, %v1016_v9 }
 0x298   : > { %645 = vst [vmem:[%s1013_s12 + $0x78] sm:$0xff] %v629_v53 }
 0x299 PF: > { %s15_s18 = sadd.s32 1, %s822_s18  }
 0x29a   : > { %p12_p4 = scmp.ge.s32.totalorder %s15_s18, 4  }
 0x29c   :  { %14 = sbr.rel (!%p12_p4) target bundleno = 1 (0x1), region = 70 }

</bundles_post_ra>
